<compile_context>
chip_gen: v7x
topology: tpu7x:2x2x1
jax: 0.10.0
libtpu: 0.0.40
codegen_flags: <defaults>
</compile_context>

<pallas_src>
import math

import jax
import jax.numpy as jnp
from jax.experimental import pallas as pl
from jax.experimental.pallas import tpu as pltpu

LANE = 128  # TPU lane width


def _round_up(v, m):
    return ((v + m - 1) // m) * m


def _pad_last(a, target):
    pad = target - a.shape[-1]
    if pad == 0:
        return a
    widths = [(0, 0)] * (a.ndim - 1) + [(0, pad)]
    return jnp.pad(a, widths)


# ---------------------------------------------------------------------------
# Single-graph kernel: grid-less, whole arrays resident in VMEM.
# ---------------------------------------------------------------------------
def pagconv_kernel(x_ref, adj_ref, m_ref, a_ref, wt_ref, b_ref, o_ref):
    # gate input features (VPU)
    mx = m_ref[...] * x_ref[...]                                        # [N, Fi]
    # neighborhood aggregation: spmm(adj, M*x) as dense matmul (MXU)
    h = jnp.dot(adj_ref[...], mx, preferred_element_type=jnp.float32)   # [N, Fi]
    # post-aggregation gate (VPU)
    h = h * a_ref[...]
    # fc: h @ W.T, with W pre-transposed in the wrapper (MXU) + bias
    o_ref[...] = (jnp.dot(h, wt_ref[...], preferred_element_type=jnp.float32)
                  + b_ref[...])                                         # [N, Fo]


def pagconv(x, adj, M, A, W, b):
    N, f_in = x.shape
    f_out = W.shape[0]
    f_in_p = _round_up(f_in, LANE)
    f_out_p = _round_up(f_out, LANE)

    # lane-dense (zero-padded) operands + one-time W transpose in the wrapper
    x_p = _pad_last(x, f_in_p)
    m_p = _pad_last(M, f_in_p)
    a_p = _pad_last(A, f_in_p)
    wt_p = jnp.pad(W.T, ((0, f_in_p - f_in), (0, f_out_p - f_out)))     # [Fi_p, Fo_p]
    b_p = jnp.pad(b, (0, f_out_p - f_out)).reshape(1, f_out_p)

    out_p = pl.pallas_call(
        pagconv_kernel,
        out_shape=jax.ShapeDtypeStruct((N, f_out_p), jnp.float32),
        in_specs=[pl.BlockSpec(memory_space=pltpu.MemorySpace.VMEM)
                  for _ in range(6)],
        out_specs=pl.BlockSpec(memory_space=pltpu.MemorySpace.VMEM),
    )(x_p, adj, m_p, a_p, wt_p, b_p)
    return out_p[:, :f_out]


# ---------------------------------------------------------------------------
# Batched kernel: many graphs through the same layer in one pallas_call.
# M, A, W, b are module parameters -> shared across the batch axis.
# ---------------------------------------------------------------------------
def pagconv_batched_kernel(x_ref, adj_ref, m_ref, a_ref, wt_ref, b_ref, o_ref):
    mx = m_ref[...] * x_ref[0]                                          # [N, Fi]
    h = jnp.dot(adj_ref[0], mx, preferred_element_type=jnp.float32)     # [N, Fi]
    h = h * a_ref[...]
    o_ref[0] = (jnp.dot(h, wt_ref[...], preferred_element_type=jnp.float32)
                + b_ref[...])                                           # [N, Fo]


def pagconv_batched(xb, adjb, M, A, W, b):
    B, N, f_in = xb.shape
    f_out = W.shape[0]
    f_in_p = _round_up(f_in, LANE)
    f_out_p = _round_up(f_out, LANE)

    xb_p = _pad_last(xb, f_in_p)
    m_p = _pad_last(M, f_in_p)
    a_p = _pad_last(A, f_in_p)
    wt_p = jnp.pad(W.T, ((0, f_in_p - f_in), (0, f_out_p - f_out)))
    b_p = jnp.pad(b, (0, f_out_p - f_out)).reshape(1, f_out_p)

    out_p = pl.pallas_call(
        pagconv_batched_kernel,
        out_shape=jax.ShapeDtypeStruct((B, N, f_out_p), jnp.float32),
        grid_spec=pltpu.PrefetchScalarGridSpec(
            num_scalar_prefetch=0,
            grid=(B,),
            in_specs=[
                pl.BlockSpec((1, N, f_in_p), lambda i: (i, 0, 0)),    # x  (per-graph)
                pl.BlockSpec((1, N, N), lambda i: (i, 0, 0)),         # adj (per-graph)
                pl.BlockSpec((N, f_in_p), lambda i: (0, 0)),          # M  (shared)
                pl.BlockSpec((N, f_in_p), lambda i: (0, 0)),          # A  (shared)
                pl.BlockSpec((f_in_p, f_out_p), lambda i: (0, 0)),    # W.T (shared)
                pl.BlockSpec((1, f_out_p), lambda i: (0, 0)),         # b  (shared)
            ],
            out_specs=pl.BlockSpec((1, N, f_out_p), lambda i: (i, 0, 0)),
        ),
        compiler_params=pltpu.CompilerParams(
            dimension_semantics=("parallel",)),   # shards across v7x's 2 TCs
    )(xb_p, adjb, m_p, a_p, wt_p, b_p)
    return out_p[:, :, :f_out]


def _xavier_uniform(key, shape, gain):
    fan_out, fan_in = shape
    bound = gain * math.sqrt(6.0 / (fan_in + fan_out))
    return jax.random.uniform(key, shape, jnp.float32, -bound, bound)


if __name__ == "__main__":
    N = 16            # number of graph nodes
    in_features = 32
    out_features = 32
    B = 4             # graphs per batched call

    key = jax.random.PRNGKey(0)
    kx, kadj, km, ka, kw, kxb, kadjb = jax.random.split(key, 7)

    x = jax.random.normal(kx, (N, in_features), jnp.float32)
    adj_raw = (jax.random.uniform(kadj, (N, N), jnp.float32) > 0.7).astype(jnp.float32)
    adj = adj_raw + jnp.eye(N, dtype=jnp.float32)
    adj = adj / jnp.sum(adj, axis=1, keepdims=True)

    M = jax.random.normal(km, (N, in_features), jnp.float32)
    A = jax.random.normal(ka, (N, in_features), jnp.float32)

    # fc parameters: xavier_uniform_(gain=1.414), bias = 0  (reset_parameters)
    W = _xavier_uniform(kw, (out_features, in_features), gain=1.414)
    b = jnp.zeros((out_features,), jnp.float32)

    # --- single-graph path (matches PaGConv.forward exactly) ---
    out = jax.block_until_ready(pagconv(x, adj, M, A, W, b))
    ref = ((adj @ (M * x)) * A) @ W.T + b
    assert out.shape == (N, out_features)
    assert jnp.allclose(out, ref, atol=1e-4, rtol=1e-4), "single-graph mismatch"

    # --- batched path (many graphs through the same layer, one pallas_call) ---
    xb = jax.random.normal(kxb, (B, N, in_features), jnp.float32)
    adjb_raw = (jax.random.uniform(kadjb, (B, N, N), jnp.float32) > 0.7).astype(jnp.float32)
    adjb = adjb_raw + jnp.eye(N, dtype=jnp.float32)
    adjb = adjb / jnp.sum(adjb, axis=2, keepdims=True)

    outb = jax.block_until_ready(pagconv_batched(xb, adjb, M, A, W, b))
    refb = (jnp.einsum("bij,bjf->bif", adjb, M * xb) * A) @ W.T + b
    assert outb.shape == (B, N, out_features)
    assert jnp.allclose(outb, refb, atol=1e-4, rtol=1e-4), "batched mismatch"

    print("KERNEL_OK")
</pallas_src>

<mosaic_0001>
module attributes {stable_mosaic.version = 11 : i64} {
  func.func @pagconv_kernel(%arg0: memref<16x128xf32, #tpu.memory_space<vmem>>, %arg1: memref<16x16xf32, #tpu.memory_space<vmem>>, %arg2: memref<16x128xf32, #tpu.memory_space<vmem>>, %arg3: memref<16x128xf32, #tpu.memory_space<vmem>>, %arg4: memref<128x128xf32, #tpu.memory_space<vmem>>, %arg5: memref<1x128xf32, #tpu.memory_space<vmem>>, %arg6: memref<16x128xf32, #tpu.memory_space<vmem>>) attributes {dimension_semantics = [], scalar_prefetch = 0 : i64, scratch_operands = 0 : i64, tpu.core_type = #tpu.core_type<tc>} {
    %c0 = arith.constant 0 : index
    %c0_0 = arith.constant 0 : index
    %0 = vector.load %arg2[%c0, %c0_0] : memref<16x128xf32, #tpu.memory_space<vmem>>, vector<16x128xf32>
    %c0_1 = arith.constant 0 : index
    %c0_2 = arith.constant 0 : index
    %1 = vector.load %arg0[%c0_1, %c0_2] : memref<16x128xf32, #tpu.memory_space<vmem>>, vector<16x128xf32>
    %2 = arith.mulf %0, %1 : vector<16x128xf32>
    %c0_3 = arith.constant 0 : index
    %c0_4 = arith.constant 0 : index
    %3 = vector.load %arg1[%c0_3, %c0_4] : memref<16x16xf32, #tpu.memory_space<vmem>>, vector<16x16xf32>
    %cst = arith.constant dense<0.000000e+00> : vector<16x128xf32>
    %4 = tpu.matmul %3, %2, %cst {dimension_numbers = #tpu.dot_dimension_numbers<[1], [0], [0], [1], [0, 0, 1, 1], [], []>} : vector<16x16xf32>, vector<16x128xf32>, vector<16x128xf32> -> vector<16x128xf32>
    %c0_5 = arith.constant 0 : index
    %c0_6 = arith.constant 0 : index
    %5 = vector.load %arg3[%c0_5, %c0_6] : memref<16x128xf32, #tpu.memory_space<vmem>>, vector<16x128xf32>
    %6 = arith.mulf %4, %5 : vector<16x128xf32>
    %c0_7 = arith.constant 0 : index
    %c0_8 = arith.constant 0 : index
    %7 = vector.load %arg4[%c0_7, %c0_8] : memref<128x128xf32, #tpu.memory_space<vmem>>, vector<128x128xf32>
    %cst_9 = arith.constant dense<0.000000e+00> : vector<16x128xf32>
    %8 = tpu.matmul %6, %7, %cst_9 {dimension_numbers = #tpu.dot_dimension_numbers<[1], [0], [0], [1], [0, 0, 1, 1], [], []>} : vector<16x128xf32>, vector<128x128xf32>, vector<16x128xf32> -> vector<16x128xf32>
    %c0_10 = arith.constant 0 : index
    %c0_11 = arith.constant 0 : index
    %9 = vector.load %arg5[%c0_10, %c0_11] : memref<1x128xf32, #tpu.memory_space<vmem>>, vector<1x128xf32>
    %10 = vector.broadcast %9 : vector<1x128xf32> to vector<16x128xf32>
    %11 = arith.addf %8, %10 : vector<16x128xf32>
    %c0_12 = arith.constant 0 : index
    %c0_13 = arith.constant 0 : index
    %12 = vector.load %arg6[%c0_12, %c0_13] : memref<16x128xf32, #tpu.memory_space<vmem>>, vector<16x128xf32>
    tpu.vector_store %arg6[%c0_12, %c0_13], %11 {strides = array<i32>} : memref<16x128xf32, #tpu.memory_space<vmem>>, vector<16x128xf32>,
    return
  }
}

</mosaic_0001>

<bundles_post_ra>
// kernel: tpu_custom_call.1
= control target key start
LH: loop header
LB: loop body
LE: loop exit
PB: predicated region body
PF: predicated region fallthrough
CT: control target
= control target key end

     0   :  { %11 = vsyncpa [#allocation3], 0  ;;  %s708_s0 = inlined_call_operand.hbm [shape: f32[16,128], index: 0, kind: input, shape index: {}]   ;;  %s709_s1 = inlined_call_operand.hbm [shape: f32[16,16], index: 1, kind: input, shape index: {}]   ;;  %s710_s2 = inlined_call_operand.hbm [shape: f32[16,128], index: 2, kind: input, shape index: {}]   ;;  %s711_s3 = inlined_call_operand.hbm [shape: f32[16,128], index: 3, kind: input, shape index: {}]   ;;  %s712_s4 = inlined_call_operand.hbm [shape: f32[128,128], index: 4, kind: input, shape index: {}]   ;;  %s713_s5 = inlined_call_operand.vmem [shape: f32[1,128], index: 5, kind: input, shape index: {}]   ;;  %s714_s6 = inlined_call_operand.hbm [shape: f32[16,128], index: 6, kind: output, shape index: {}]  }
   0x1   :  { %12 = vsyncpa [#allocation6], 0 }
   0x2   :  { %13 = vsyncpa [#allocation9], 0 }
   0x3   :  { %14 = vsyncpa [#allocation4], 0  ;;  %s556_s21 = smov [#allocation5]   ;;  %s557_s23 = smov [#allocation8]  }
   0x4   :  { %s32_s22 = sshll.u32 %s556_s21, 4  ;;  %s56_s24 = sshll.u32 %s557_s23, 4  ;;  %s33_s22 = int_to_ptr.vmem [resolvable:$true] %s32_s22  ;;  %s599_s24 = int_to_ptr.vmem [resolvable:$true] %s56_s24 }
   0x5   :  { %s416_s27 = scalar_lea.hbm %s709_s1, 256 }
   0x6   :  { %p417_p0 = scmp.ne.s32.totalorder %s709_s1, %s416_s27  ;;  %p420_p1 = scmp.lt.u32.totalorder %s416_s27, %s709_s1 }
   0x8   :  { %p422_p2 = pnand %p420_p1, %p417_p0 }
   0xa   :  { %425 = shalt.err (!%p422_p2)
}
   0xb   :  { %s426_s8 = scalar_lea.vmem %s33_s22, 256  ;;  %p431_p4 = scmp.lt.s32.totalorder %s33_s22, %s33_s22 }
   0xc   :  { %p427_p3 = scmp.ne.s32.totalorder %s33_s22, %s426_s8  ;;  %p432_p5 = scmp.lt.s32.totalorder %s426_s8, %s426_s8 }
   0xe   :  { %p433_p6 = por %p432_p5, %p431_p4 }
  0x10   :  { %p434_p7 = pnand %p433_p6, %p427_p3 }
  0x12   :  { %437 = shalt.err (!%p434_p7)
}
  0x13   :  { %s558_s9 = smov 128   ;;  %s559_s10 = smov 8  }
  0x14   :  { %38 = dma.hbm_to_vmem [thread:$0]  %s709_s1, 256, %s33_s22, [#allocation6], %s558_s9, %s558_s9, %s559_s10  }
  0x15   :  { %s438_s15 = scalar_lea.hbm %s711_s3, 256 }
  0x16   :  { %p439_p8 = scmp.ne.s32.totalorder %s711_s3, %s438_s15  ;;  %p442_p9 = scmp.lt.u32.totalorder %s438_s15, %s711_s3 }
  0x18   :  { %p444_p10 = pnand %p442_p9, %p439_p8 }
  0x1a   :  { %447 = shalt.err (!%p444_p10)
}
  0x1b   :  { %s448_s20 = scalar_lea.vmem %s599_s24, 256  ;;  %p453_p12 = scmp.lt.s32.totalorder %s599_s24, %s599_s24 }
  0x1c   :  { %p449_p11 = scmp.ne.s32.totalorder %s599_s24, %s448_s20  ;;  %p454_p13 = scmp.lt.s32.totalorder %s448_s20, %s448_s20 }
  0x1e   :  { %p455_p0 = por %p454_p13, %p453_p12 }
  0x20   :  { %p456_p1 = pnand %p455_p0, %p449_p11 }
  0x22   :  { %459 = shalt.err (!%p456_p1)
}
  0x23   :  { %62 = dma.hbm_to_vmem [thread:$0]  %s711_s3, 256, %s599_s24, [#allocation9], %s558_s9, %s558_s9, %s559_s10  }
  0x24   :  { %s560_s22 = smov [#allocation2]   ;;  %s561_s25 = smov [#allocation7]  }
  0x25   :  { %s20_s23 = sshll.u32 %s560_s22, 4  ;;  %s44_s26 = sshll.u32 %s561_s25, 4  ;;  %s21_s23 = int_to_ptr.vmem [resolvable:$true] %s20_s23  ;;  %s636_s26 = int_to_ptr.vmem [resolvable:$true] %s44_s26 }
  0x26   :  { %s460_s29 = scalar_lea.hbm %s708_s0, 256 }
  0x27   :  { %p461_p2 = scmp.ne.s32.totalorder %s708_s0, %s460_s29  ;;  %p464_p3 = scmp.lt.u32.totalorder %s460_s29, %s708_s0 }
  0x29   :  { %p466_p4 = pnand %p464_p3, %p461_p2 }
  0x2b   :  { %469 = shalt.err (!%p466_p4)
}
  0x2c   :  { %s470_s3 = scalar_lea.vmem %s21_s23, 256  ;;  %p475_p6 = scmp.lt.s32.totalorder %s21_s23, %s21_s23 }
  0x2d   :  { %p471_p5 = scmp.ne.s32.totalorder %s21_s23, %s470_s3  ;;  %p476_p7 = scmp.lt.s32.totalorder %s470_s3, %s470_s3 }
  0x2f   :  { %p477_p8 = por %p476_p7, %p475_p6 }
  0x31   :  { %p478_p9 = pnand %p477_p8, %p471_p5 }
  0x33   :  { %481 = shalt.err (!%p478_p9)
}
  0x34   :  { %26 = dma.hbm_to_vmem [thread:$0]  %s708_s0, 256, %s21_s23, [#allocation3], %s558_s9, %s558_s9, %s559_s10  }
  0x35   :  { %s482_s15 = scalar_lea.hbm %s710_s2, 256 }
  0x36   :  { %p483_p10 = scmp.ne.s32.totalorder %s710_s2, %s482_s15  ;;  %p486_p11 = scmp.lt.u32.totalorder %s482_s15, %s710_s2 }
  0x38   :  { %p488_p12 = pnand %p486_p11, %p483_p10 }
  0x3a   :  { %491 = shalt.err (!%p488_p12)
}
  0x3b   :  { %s492_s20 = scalar_lea.vmem %s636_s26, 256  ;;  %p497_p0 = scmp.lt.s32.totalorder %s636_s26, %s636_s26 }
  0x3c   :  { %p493_p13 = scmp.ne.s32.totalorder %s636_s26, %s492_s20  ;;  %p498_p1 = scmp.lt.s32.totalorder %s492_s20, %s492_s20 }
  0x3e   :  { %p499_p2 = por %p498_p1, %p497_p0 }
  0x40   :  { %p500_p3 = pnand %p499_p2, %p493_p13 }
  0x42   :  { %503 = shalt.err (!%p500_p3)
}
  0x43   :  { %50 = dma.hbm_to_vmem [thread:$0]  %s710_s2, 256, %s636_s26, [#allocation6], %s558_s9, %s558_s9, %s559_s10  }
  0x44   :  { %s562_s21 = smov [#allocation10]   ;;  %s504_s27 = scalar_lea.hbm %s712_s4, 2048 }
  0x45   :  { %s68_s22 = sshll.u32 %s562_s21, 4  ;;  %p505_p4 = scmp.ne.s32.totalorder %s712_s4, %s504_s27  ;;  %s69_s22 = int_to_ptr.vmem [resolvable:$true] %s68_s22 }
  0x46   :  { %p508_p5 = scmp.lt.u32.totalorder %s504_s27, %s712_s4 }
  0x48   :  { %p510_p6 = pnand %p508_p5, %p505_p4 }
  0x4a   :  { %513 = shalt.err (!%p510_p6)
}
  0x4b   :  { %s514_s8 = scalar_lea.vmem %s69_s22, 2048  ;;  %p519_p8 = scmp.lt.s32.totalorder %s69_s22, %s69_s22 }
  0x4c   :  { %p515_p7 = scmp.ne.s32.totalorder %s69_s22, %s514_s8  ;;  %p520_p9 = scmp.lt.s32.totalorder %s514_s8, %s514_s8 }
  0x4e   :  { %p521_p10 = por %p520_p9, %p519_p8 }
  0x50   :  { %p522_p11 = pnand %p521_p10, %p515_p7 }
  0x52   :  { %525 = shalt.err (!%p522_p11)
}
  0x53   :  { %74 = dma.hbm_to_vmem [thread:$0]  %s712_s4, 2048, %s69_s22, [#allocation9], %s558_s9, %s558_s9, %s559_s10  }
  0x54   :  { %548 = dma.done.wait [#allocation3], 256  }
  0x55   :  { %549 = vsyncadd [#allocation3], 4294967040 }
  0x56   :  { %550 = dma.done.wait [#allocation6], 512  }
  0x57   :  { %551 = vsyncadd [#allocation6], 4294966784 }
  0x58   :  { %552 = dma.done.wait [#allocation9], 2304  }
  0x59   :  { %553 = vsyncadd [#allocation9], 4294964992  ;;  %vm100_vm0 = vcmask 130048   ;;  %v92_v0 = vld [vmem:[#allocation7] sm:$0xff]  ;;  %v93_v1 = vld [vmem:[#allocation7 + $0x8] sm:$0xff]  ;;  %s563_s3 = smov [#allocation11]  }
  0x5a   :  { %v94_v2 = vld [vmem:[#allocation2] sm:$0xff]  ;;  %v95_v3 = vld [vmem:[#allocation2 + $0x8] sm:$0xff]  ;;  %v98_v5 = vld [vmem:[#allocation5] sm:$0xff]  ;;  %s291_s24 = sshll.u32 %s563_s3, 4  ;;  %s292_s24 = int_to_ptr.vmem [resolvable:$true] %s291_s24 }
  0x5b   :  { %v96_v4 = vmul.f32 %v94_v2, %v92_v0  ;;  %v97_v6 = vmul.f32 %v95_v3, %v93_v1  ;;  %334 = vmatprep.mubr.msk.f32.mxu0 %vm100_vm0, %v98_v5  ;;  %v186_v7 = vld [vmem:[#allocation10] sm:$0xff]  ;;  %v187_v8 = vld [vmem:[#allocation10 + $0x8] sm:$0xff]  ;;  %v188_v9 = vld [vmem:[#allocation10 + $0x10] sm:$0xff]  ;;  %s526_s12 = scalar_lea.vmem %s292_s24, 256  ;;  %p531_p13 = scmp.lt.s32.totalorder %s292_s24, %s292_s24 }
  0x5c   :  { %v376_v10 = vpack.c.bf16 %v187_v8, %v186_v7  ;;  %v189_v11 = vld [vmem:[#allocation10 + $0x18] sm:$0xff]  ;;  %v190_v14 = vld [vmem:[#allocation10 + $0x20] sm:$0xff]  ;;  %v191_v15 = vld [vmem:[#allocation10 + $0x28] sm:$0xff]  ;;  %p527_p12 = scmp.ne.s32.totalorder %s292_s24, %s526_s12  ;;  %p532_p0 = scmp.lt.s32.totalorder %s526_s12, %s526_s12 }
  0x5d   :  { %v372_v12 = vpack.c.bf16 %v97_v6, %v96_v4  ;;  %v380_v13 = vpack.c.bf16 %v189_v11, %v188_v9  ;;  %v99_v16 = vld [vmem:[#allocation5 + $0x8] sm:$0xff]  ;;  %v384_v17 = vpack.c.bf16 %v191_v15, %v190_v14  ;;  %v192_v18 = vld [vmem:[#allocation10 + $0x30] sm:$0xff]  ;;  %v194_v21 = vld [vmem:[#allocation10 + $0x40] sm:$0xff] }
  0x5e   :  { %377 = vmatprep.subr.bf16.mxu1 %v376_v10  ;;  %v193_v19 = vld [vmem:[#allocation10 + $0x38] sm:$0xff]  ;;  %v195_v22 = vld [vmem:[#allocation10 + $0x48] sm:$0xff]  ;;  %v196_v24 = vld [vmem:[#allocation10 + $0x50] sm:$0xff]  ;;  %p533_p1 = por %p532_p0, %p531_p13 }
  0x5f   :  { %373 = vmatprep.subr.bf16.mxu0 %v372_v12  ;;  %379 = vmatpush3.bf16.msra.mxu1 %v376_v10  ;;  %v388_v20 = vpack.c.bf16 %v193_v19, %v192_v18  ;;  %v392_v23 = vpack.c.bf16 %v195_v22, %v194_v21  ;;  %v197_v25 = vld [vmem:[#allocation10 + $0x58] sm:$0xff]  ;;  %v198_v27 = vld [vmem:[#allocation10 + $0x60] sm:$0xff]  ;;  %v199_v28 = vld [vmem:[#allocation10 + $0x68] sm:$0xff] }
  0x60   :  { %375 = vmatpush3.bf16.msra.mxu0 %v372_v12  ;;  %381 = vmatprep.subr.bf16.mxu1 %v380_v13  ;;  %v396_v26 = vpack.c.bf16 %v197_v25, %v196_v24  ;;  %v400_v29 = vpack.c.bf16 %v199_v28, %v198_v27  ;;  %v200_v30 = vld [vmem:[#allocation10 + $0x70] sm:$0xff]  ;;  %v201_v31 = vld [vmem:[#allocation10 + $0x78] sm:$0xff]  ;;  %v307_v39 = vld [vmem:[%s713_s5] ss:$0 sm:$0xff]  ;;  %p534_p2 = pnand %p533_p1, %p527_p12 }
  0x61   :  { %v404_v32 = vpack.c.bf16 %v201_v31, %v200_v30  ;;  %v182_v33 = vld [vmem:[#allocation8] sm:$0xff]  ;;  %v183_v35 = vld [vmem:[#allocation8 + $0x8] sm:$0xff] }
  0x63   :  { %335 = vmatmul.mubr.msk.f32.vlgmr.msra.gmra.mrb[0].mxu0 %vm100_vm0, %v99_v16  ;;  %383 = vmatpush3.bf16.msra.mxu1 %v380_v13 }
  0x64   :  { %385 = vmatprep.subr.bf16.mxu1 %v384_v17 }
  0x67   :  { %387 = vmatpush3.bf16.msra.mxu1 %v384_v17 }
  0x68   :  { %389 = vmatprep.subr.bf16.mxu1 %v388_v20 }
  0x6b   :  { %391 = vmatpush3.bf16.msra.mxu1 %v388_v20 }
  0x6c   :  { %393 = vmatprep.subr.bf16.mxu1 %v392_v23 }
  0x6f   :  { %395 = vmatpush3.bf16.msra.mxu1 %v392_v23 }
  0x70   :  { %397 = vmatprep.subr.bf16.mxu1 %v396_v26 }
  0x73   :  { %399 = vmatpush3.bf16.msra.mxu1 %v396_v26 }
  0x74   :  { %401 = vmatprep.subr.bf16.mxu1 %v400_v29 }
  0x77   :  { %403 = vmatpush3.bf16.msra.mxu1 %v400_v29 }
  0x78   :  { %405 = vmatprep.subr.bf16.mxu1 %v404_v32 }
  0x7b   :  { %407 = vmatpush3.bf16.msra.mxu1 %v404_v32 }
 0x136   :  { %v336_v34 = vpop.f32.mrb[0].mxu0 }
 0x137   :  { %v173_v36 = vpop.f32.mrb[1].mxu0  ;;  %v185_v38 = vmul.f32 %v336_v34, %v183_v35 }
 0x138   :  { %v184_v37 = vmul.f32 %v182_v33, %v173_v36 }
 0x13a   :  { %369 = vmatprep.mubr.f32.mxu1 %v184_v37 }
 0x13b   :  { %370 = vmatmul.mubr.f32.vlgmr.msra.gmra.mrb[0].mxu1 %v185_v38 }
 0x20e   :  { %v371_v40 = vpop.f32.mrb[0].mxu1 }
 0x20f   :  { %v281_v41 = vadd.f32 %v371_v40, %v307_v39  ;;  %v275_v42 = vpop.f32.mrb[1].mxu1 }
 0x210   :  { %v276_v43 = vadd.f32 %v307_v39, %v275_v42 }
 0x211   :  { %285 = vst [vmem:[#allocation11 + $0x8] sm:$0xff] %v281_v41 }
 0x212   :  { %284 = vst [vmem:[#allocation11] sm:$0xff] %v276_v43 }
 0x213   :  { %537 = shalt.err (!%p534_p2)
}
 0x214   :  { %s538_s5 = scalar_lea.hbm %s714_s6, 256 }
 0x215   :  { %p539_p3 = scmp.ne.s32.totalorder %s714_s6, %s538_s5  ;;  %p542_p4 = scmp.lt.u32.totalorder %s538_s5, %s714_s6 }
 0x217   :  { %p544_p5 = pnand %p542_p4, %p539_p3 }
 0x219   :  { %547 = shalt.err (!%p544_p5)
}
 0x21a   :  { %297 = dma.vmem_to_hbm [thread:$0]  %s292_s24, 256, %s714_s6, [#allocation4], %s558_s9, %s558_s9, %s559_s10  }
 0x21b   :  { %554 = dma.done.wait [#allocation4], 256  }
 0x21c   :  { %555 = vsyncadd [#allocation4], 4294967040 }
 0x21d   :  { %301 = vsyncpa [#allocation3], 1 }
 0x21e   :  { %302 = vsyncpa [#allocation6], 1 }
 0x21f   :  { %303 = vsyncpa [#allocation9], 1 }
 0x220   :  { %304 = vsyncpa [#allocation4], 1 }

</bundles_post_ra>
